<compile_context>
chip_gen: v7x
topology: tpu7x:2x2x1
jax: 0.10.0
libtpu: 0.0.40
codegen_flags: <defaults>
</compile_context>

<pallas_src>
import functools

import jax
import jax.numpy as jnp
from jax.experimental import pallas as pl
from jax.experimental.pallas import tpu as pltpu

# ----------------------------- config ---------------------------------------
HIDDEN = 128      # d_model, padded to the 128-lane vreg width
VOCAB = 512       # vocab_size (multiple of the vocab tile)
V_TILE = 256      # lm_head / CE vocab tile (lane-dense, pipelined over grid)
SL_FEAT = 128     # per-edge structural feature width (sl_feats last dim)
PAD_ID = 0        # T5 pad token id (ignored positions in the CE loss)
DEC_START = 0     # T5 decoder_start_token_id
NEG_INF = -1e9


# ----------------------- fused encoder-layer kernel --------------------------
def _encoder_kernel(x_ref, kbias_ref, wqkv_ref, wo_ref, out_ref, attn_ref, *, scale):
    # x: (S, H) bf16, kbias: (1, S) f32 additive key-padding bias,
    # wqkv: (H, 3H) bf16 stacked Q/K/V, wo: (H, H) bf16.
    x = x_ref[...]
    qkv = jnp.dot(x, wqkv_ref[...], preferred_element_type=jnp.float32)    # (S, 3H)
    q = qkv[:, :HIDDEN].astype(jnp.bfloat16)
    k = qkv[:, HIDDEN:2 * HIDDEN].astype(jnp.bfloat16)
    v = qkv[:, 2 * HIDDEN:].astype(jnp.bfloat16)
    s = jax.lax.dot_general(q, k, (((1,), (1,)), ((), ())),
                            preferred_element_type=jnp.float32) * scale    # (S, S)
    s = s + kbias_ref[...]                                                 # mask padded keys
    m = jnp.max(s, axis=-1, keepdims=True)
    e = jnp.exp(s - m)
    p = e * pl.reciprocal(jnp.sum(e, axis=-1, keepdims=True), approx=True)
    attn_ref[...] = p                                                      # encoder_attentions
    ctx = jnp.dot(p.astype(jnp.bfloat16), v, preferred_element_type=jnp.float32)
    out = x.astype(jnp.float32) + jnp.dot(ctx.astype(jnp.bfloat16), wo_ref[...],
                                          preferred_element_type=jnp.float32)
    out_ref[...] = out.astype(out_ref.dtype)


def encoder_layer(x, key_bias, wqkv, wo):
    """x: [B,S,H] bf16, key_bias: [B,1,S] f32 -> (hidden [B,S,H] bf16, probs [B,S,S] f32)."""
    B, S, H = x.shape
    kernel = functools.partial(_encoder_kernel, scale=1.0 / (H ** 0.5))
    return pl.pallas_call(
        kernel,
        out_shape=(jax.ShapeDtypeStruct((B, S, H), jnp.bfloat16),
                   jax.ShapeDtypeStruct((B, S, S), jnp.float32)),
        grid=(B,),
        in_specs=[pl.BlockSpec((pl.Squeezed(), S, H), lambda b: (b, 0, 0)),
                  pl.BlockSpec((pl.Squeezed(), 1, S), lambda b: (b, 0, 0)),
                  pl.BlockSpec((H, 3 * H), lambda b: (0, 0)),
                  pl.BlockSpec((H, H), lambda b: (0, 0))],
        out_specs=(pl.BlockSpec((pl.Squeezed(), S, H), lambda b: (b, 0, 0)),
                   pl.BlockSpec((pl.Squeezed(), S, S), lambda b: (b, 0, 0))),
        compiler_params=pltpu.CompilerParams(dimension_semantics=("parallel",)),
    )(x, key_bias, wqkv, wo)


# ----------------------- fused decoder-layer kernel --------------------------
def _decoder_kernel(y_ref, enc_ref, dec_kbias_ref, enc_kbias_ref,
                    wqkv_ref, wo_ref, wq_c_ref, wkv_c_ref, wo_c_ref,
                    out_ref, *, scale):
    # y: (T, H) bf16 decoder input embeddings, enc: (S, H) bf16 encoder output.
    y = y_ref[...]
    enc = enc_ref[...]
    t = y.shape[0]

    # ---- causal + key-padded self-attention ----
    qkv = jnp.dot(y, wqkv_ref[...], preferred_element_type=jnp.float32)    # (T, 3H)
    q = qkv[:, :HIDDEN].astype(jnp.bfloat16)
    k = qkv[:, HIDDEN:2 * HIDDEN].astype(jnp.bfloat16)
    v = qkv[:, 2 * HIDDEN:].astype(jnp.bfloat16)
    s = jax.lax.dot_general(q, k, (((1,), (1,)), ((), ())),
                            preferred_element_type=jnp.float32) * scale    # (T, T)
    row = jax.lax.broadcasted_iota(jnp.int32, (t, t), 0)
    col = jax.lax.broadcasted_iota(jnp.int32, (t, t), 1)
    s = jnp.where(row >= col, s, NEG_INF) + dec_kbias_ref[...]
    m = jnp.max(s, axis=-1, keepdims=True)
    e = jnp.exp(s - m)
    p = e * pl.reciprocal(jnp.sum(e, axis=-1, keepdims=True), approx=True)
    ctx = jnp.dot(p.astype(jnp.bfloat16), v, preferred_element_type=jnp.float32)
    y1 = y.astype(jnp.float32) + jnp.dot(ctx.astype(jnp.bfloat16), wo_ref[...],
                                         preferred_element_type=jnp.float32)

    # ---- cross-attention over the encoder output (probs not emitted) ----
    qc = jnp.dot(y1.astype(jnp.bfloat16), wq_c_ref[...],
                 preferred_element_type=jnp.float32).astype(jnp.bfloat16)  # (T, H)
    kv = jnp.dot(enc, wkv_c_ref[...], preferred_element_type=jnp.float32)  # (S, 2H)
    kc = kv[:, :HIDDEN].astype(jnp.bfloat16)
    vc = kv[:, HIDDEN:].astype(jnp.bfloat16)
    sc = jax.lax.dot_general(qc, kc, (((1,), (1,)), ((), ())),
                             preferred_element_type=jnp.float32) * scale   # (T, S)
    sc = sc + enc_kbias_ref[...]
    mc = jnp.max(sc, axis=-1, keepdims=True)
    ec = jnp.exp(sc - mc)
    pc = ec * pl.reciprocal(jnp.sum(ec, axis=-1, keepdims=True), approx=True)
    ctxc = jnp.dot(pc.astype(jnp.bfloat16), vc, preferred_element_type=jnp.float32)
    out = y1 + jnp.dot(ctxc.astype(jnp.bfloat16), wo_c_ref[...],
                       preferred_element_type=jnp.float32)
    out_ref[...] = out.astype(out_ref.dtype)


def decoder_layer(y, enc, dec_key_bias, enc_key_bias, wqkv, wo, wq_c, wkv_c, wo_c):
    """Fused decoder self-attn + cross-attn.  Returns last_hidden_state [B,T,H] bf16."""
    B, T, H = y.shape
    _, S, _ = enc.shape
    kernel = functools.partial(_decoder_kernel, scale=1.0 / (H ** 0.5))
    return pl.pallas_call(
        kernel,
        out_shape=jax.ShapeDtypeStruct((B, T, H), jnp.bfloat16),
        grid=(B,),
        in_specs=[pl.BlockSpec((pl.Squeezed(), T, H), lambda b: (b, 0, 0)),
                  pl.BlockSpec((pl.Squeezed(), S, H), lambda b: (b, 0, 0)),
                  pl.BlockSpec((pl.Squeezed(), 1, T), lambda b: (b, 0, 0)),
                  pl.BlockSpec((pl.Squeezed(), 1, S), lambda b: (b, 0, 0)),
                  pl.BlockSpec((H, 3 * H), lambda b: (0, 0)),
                  pl.BlockSpec((H, H), lambda b: (0, 0)),
                  pl.BlockSpec((H, H), lambda b: (0, 0)),
                  pl.BlockSpec((H, 2 * H), lambda b: (0, 0)),
                  pl.BlockSpec((H, H), lambda b: (0, 0))],
        out_specs=pl.BlockSpec((pl.Squeezed(), T, H), lambda b: (b, 0, 0)),
        compiler_params=pltpu.CompilerParams(dimension_semantics=("parallel",)),
    )(y, enc, dec_key_bias, enc_key_bias, wqkv, wo, wq_c, wkv_c, wo_c)


# -------------- vocab-tiled tied lm_head + masked cross-entropy --------------
def _ce_kernel(hid_ref, embt_ref, lab_ref, sum_ref, cnt_ref, m_sc, l_sc, g_sc):
    # hid: (N, H) bf16, embt: (H, Vt) bf16 tile of the pre-transposed tied
    # embedding, lab: (N, 1) int32.  Online logsumexp across vocab tiles.
    j = pl.program_id(0)

    @pl.when(j == 0)
    def _():
        m_sc[...] = jnp.full_like(m_sc, -jnp.inf)
        l_sc[...] = jnp.zeros_like(l_sc)
        g_sc[...] = jnp.zeros_like(g_sc)

    logits = jnp.dot(hid_ref[...], embt_ref[...],
                     preferred_element_type=jnp.float32)                   # (N, Vt)
    lab = lab_ref[...]                                                     # (N, 1)
    n, vt = logits.shape
    col = jax.lax.broadcasted_iota(jnp.int32, (n, vt), 1) + j * vt
    g_sc[...] += jnp.sum(jnp.where(col == lab, logits, 0.0), axis=-1, keepdims=True)
    m_new = jnp.maximum(m_sc[...], jnp.max(logits, axis=-1, keepdims=True))
    l_sc[...] = (l_sc[...] * jnp.exp(m_sc[...] - m_new)
                 + jnp.sum(jnp.exp(logits - m_new), axis=-1, keepdims=True))
    m_sc[...] = m_new

    @pl.when(j == pl.num_programs(0) - 1)
    def _():
        lse = m_sc[...] + jnp.log(l_sc[...])
        per_tok = lse - g_sc[...]                                          # -log p(label)
        active = (lab != PAD_ID).astype(jnp.float32)
        sum_ref[...] = jnp.sum(per_tok * active, keepdims=True)
        cnt_ref[...] = jnp.sum(active, keepdims=True)


def lm_head_cross_entropy(hidden, emb_t, labels):
    """hidden: [N,H] bf16, emb_t: [H,V] bf16 (tied lm_head, pre-transposed),
    labels: [N,1] int32.  Returns (sum_loss, active_count) scalars."""
    N, H = hidden.shape
    _, V = emb_t.shape
    n_tiles = V // V_TILE
    s, c = pl.pallas_call(
        _ce_kernel,
        out_shape=(jax.ShapeDtypeStruct((1, 1), jnp.float32),
                   jax.ShapeDtypeStruct((1, 1), jnp.float32)),
        grid=(n_tiles,),
        in_specs=[pl.BlockSpec((N, H), lambda j: (0, 0)),
                  pl.BlockSpec((H, V_TILE), lambda j: (0, j)),
                  pl.BlockSpec((N, 1), lambda j: (0, 0))],
        out_specs=(pl.BlockSpec((1, 1), lambda j: (0, 0)),
                   pl.BlockSpec((1, 1), lambda j: (0, 0))),
        scratch_shapes=[pltpu.VMEM((N, 1), jnp.float32),
                        pltpu.VMEM((N, 1), jnp.float32),
                        pltpu.VMEM((N, 1), jnp.float32)],
        compiler_params=pltpu.CompilerParams(dimension_semantics=("arbitrary",)),
    )(hidden, emb_t, labels)
    return s[0, 0], c[0, 0]


# -------------- struc_encoder + attention-difference loss --------------------
def _struc_kernel(sl_ref, w_ref, attn_ref, loss_ref, *, inv_norm):
    # sl: (S, S, F) f32, w: (1, F) f32 struc_encoder projection,
    # attn: (S, S) f32 selected encoder attention probs.
    b = pl.program_id(0)

    @pl.when(b == 0)
    def _():
        loss_ref[...] = jnp.zeros_like(loss_ref)

    logit = jnp.sum(sl_ref[...] * w_ref[...][None, :, :], axis=-1)         # (S, S)
    logit = logit - jnp.max(logit, axis=-1, keepdims=True)
    e = jnp.exp(logit)
    struc = e * pl.reciprocal(jnp.sum(e, axis=-1, keepdims=True), approx=True)
    d = struc - attn_ref[...]
    # TODO(synk): geomloss SamplesLoss('sinkhorn', p=2, blur=0.05) (Wasserstein OT)
    # has no clean Pallas equivalent; squared-difference surrogate used instead.
    loss_ref[...] += jnp.sum(d * d, keepdims=True) * inv_norm


def struc_attention_loss(sl_feats, w_struc, enc_attn):
    """sl_feats: [B,S,S,F] f32, w_struc: [1,F] f32, enc_attn: [B,S,S] f32 -> scalar."""
    B, S, _, F = sl_feats.shape
    kernel = functools.partial(_struc_kernel, inv_norm=1.0 / (S * S))
    loss = pl.pallas_call(
        kernel,
        out_shape=jax.ShapeDtypeStruct((1, 1), jnp.float32),
        grid=(B,),
        in_specs=[pl.BlockSpec((pl.Squeezed(), S, S, F), lambda b: (b, 0, 0, 0)),
                  pl.BlockSpec((1, F), lambda b: (0, 0)),
                  pl.BlockSpec((pl.Squeezed(), S, S), lambda b: (b, 0, 0))],
        out_specs=pl.BlockSpec((1, 1), lambda b: (0, 0)),
        compiler_params=pltpu.CompilerParams(dimension_semantics=("arbitrary",)),
    )(sl_feats, w_struc, enc_attn)
    return loss[0, 0]


# ------------------------ parameters (deterministic) -------------------------
def init_params(key):
    ks = jax.random.split(key, 9)
    sc = 0.02
    f32, bf16 = jnp.float32, jnp.bfloat16
    return {
        # tied token embedding / lm_head
        "emb": jax.random.normal(ks[0], (VOCAB, HIDDEN), f32) * sc,
        # encoder: stacked Q/K/V + output projection
        "enc_wqkv": (jax.random.normal(ks[1], (HIDDEN, 3 * HIDDEN), f32) * sc).astype(bf16),
        "enc_wo": (jax.random.normal(ks[2], (HIDDEN, HIDDEN), f32) * sc).astype(bf16),
        # decoder self-attention
        "dec_wqkv": (jax.random.normal(ks[3], (HIDDEN, 3 * HIDDEN), f32) * sc).astype(bf16),
        "dec_wo": (jax.random.normal(ks[4], (HIDDEN, HIDDEN), f32) * sc).astype(bf16),
        # decoder cross-attention (stacked K/V over the encoder output)
        "crs_wq": (jax.random.normal(ks[5], (HIDDEN, HIDDEN), f32) * sc).astype(bf16),
        "crs_wkv": (jax.random.normal(ks[6], (HIDDEN, 2 * HIDDEN), f32) * sc).astype(bf16),
        "crs_wo": (jax.random.normal(ks[7], (HIDDEN, HIDDEN), f32) * sc).astype(bf16),
        # struc_encoder: per-edge feature -> scalar attention logit
        "w_struc": jax.random.normal(ks[8], (1, SL_FEAT), f32) * sc,
    }


# ------------------------------ forward --------------------------------------
def shift_right(labels):
    """T5 _shift_right: prepend decoder_start_token_id, drop the last position."""
    B = labels.shape[0]
    start = jnp.full((B, 1), DEC_START, labels.dtype)
    return jnp.concatenate([start, labels[:, :-1]], axis=1)


def make_decoder_attention_mask(labels):
    B = labels.shape[0]
    valid = (labels[:, :-1] != PAD_ID).astype(jnp.int32)
    return jnp.concatenate([jnp.ones((B, 1), jnp.int32), valid], axis=1)


def codet5_with_sl_forward(params, input_ids, attention_mask, labels,
                           decoder_attention_mask=None, sl_feats=None,
                           max_source_length=None):
    """Mirrors Codet5WithSL.forward: returns (loss, struc_loss)."""
    B, S = input_ids.shape
    emb = params["emb"]

    if decoder_attention_mask is None:
        decoder_attention_mask = make_decoder_attention_mask(labels)

    # additive key-padding biases; full [B,Tq,Tk] masks are built in-kernel.
    enc_key_bias = jnp.where(attention_mask != 0, 0.0, NEG_INF
                             ).astype(jnp.float32)[:, None, :]             # (B,1,S)
    dec_key_bias = jnp.where(decoder_attention_mask != 0, 0.0, NEG_INF
                             ).astype(jnp.float32)[:, None, :]             # (B,1,T)

    # ------------------------------ t5_model ------------------------------
    # TODO(synk): full T5 stack (multi-layer/head, layernorm, rel-pos bias, FFN)
    # reduced to one deterministic single-head encoder layer + decoder layer.
    src_x = emb[input_ids].astype(jnp.bfloat16)                            # (B,S,H)
    enc_hidden, encoder_attention = encoder_layer(
        src_x, enc_key_bias, params["enc_wqkv"], params["enc_wo"])

    dec_in = shift_right(labels)
    tgt_x = emb[dec_in].astype(jnp.bfloat16)                               # (B,T,H)
    dec_hidden = decoder_layer(
        tgt_x, enc_hidden, dec_key_bias, enc_key_bias,
        params["dec_wqkv"], params["dec_wo"],
        params["crs_wq"], params["crs_wkv"], params["crs_wo"])             # (B,T,H)

    # tied lm_head + padding-masked cross-entropy over all label positions
    emb_t = emb.T.astype(jnp.bfloat16)                                     # (H,V)
    sum_loss, cnt = lm_head_cross_entropy(
        dec_hidden.reshape(-1, HIDDEN), emb_t,
        labels.reshape(-1, 1).astype(jnp.int32))
    loss = sum_loss / jnp.maximum(cnt, 1.0)                                # guard all-pad

    # ---------------------- structural attention loss ----------------------
    if sl_feats is not None:
        sl = sl_feats.reshape(B, max_source_length, max_source_length, -1)
        struc_loss = struc_attention_loss(sl, params["w_struc"], encoder_attention)
    else:
        struc_loss = jnp.float32(0.0)
    return loss, struc_loss


# -------------------------------- main ---------------------------------------
if __name__ == "__main__":
    key = jax.random.PRNGKey(0)
    pk, ik, lk, fk = jax.random.split(key, 4)
    params = init_params(pk)

    B, S, T = 2, 8, 8
    input_ids = jax.random.randint(ik, (B, S), 2, VOCAB, dtype=jnp.int32)
    labels = jax.random.randint(lk, (B, T), 2, VOCAB, dtype=jnp.int32)
    # pad a few positions to exercise the attention / loss masks
    input_ids = input_ids.at[0, 6:].set(PAD_ID)
    labels = labels.at[1, 5:].set(PAD_ID)
    attention_mask = (input_ids != PAD_ID).astype(jnp.int32)
    decoder_attention_mask = make_decoder_attention_mask(labels)
    sl_feats = jax.random.normal(fk, (B, S * S * SL_FEAT), jnp.float32)    # flat, .view'd in forward

    loss, struc_loss = codet5_with_sl_forward(
        params, input_ids, attention_mask, labels,
        decoder_attention_mask=decoder_attention_mask,
        sl_feats=sl_feats, max_source_length=S)
    jax.block_until_ready((loss, struc_loss))
    assert jnp.isfinite(loss) and jnp.isfinite(struc_loss), "non-finite loss"
    print("KERNEL_OK")
</pallas_src>

<mosaic_0001>
module attributes {stable_mosaic.version = 11 : i64} {
  func.func @_encoder_kernel(%arg0: i32, %arg1: memref<1x8x128xbf16, #tpu.memory_space<vmem>>, %arg2: memref<1x1x8xf32, #tpu.memory_space<vmem>>, %arg3: memref<128x384xbf16, #tpu.memory_space<vmem>>, %arg4: memref<128x128xbf16, #tpu.memory_space<vmem>>, %arg5: memref<1x8x128xbf16, #tpu.memory_space<vmem>>, %arg6: memref<1x8x8xf32, #tpu.memory_space<vmem>>) attributes {dimension_semantics = [#tpu.dimension_semantics<parallel>], iteration_bounds = array<i64: 2>, scalar_prefetch = 0 : i64, scratch_operands = 0 : i64, tpu.core_type = #tpu.core_type<tc>, window_params = [{transform_indices = @transform_0, window_bounds = array<i64: 1, 8, 128>}, {transform_indices = @transform_1, window_bounds = array<i64: 1, 1, 8>}, {pipeline_mode = #tpu.pipeline_mode<synchronous>, transform_indices = @transform_2, window_bounds = array<i64: 128, 384>}, {pipeline_mode = #tpu.pipeline_mode<synchronous>, transform_indices = @transform_3, window_bounds = array<i64: 128, 128>}, {transform_indices = @transform_4, window_bounds = array<i64: 1, 8, 128>}, {transform_indices = @transform_5, window_bounds = array<i64: 1, 8, 8>}]} {
    %c0 = arith.constant 0 : index
    %c0_0 = arith.constant 0 : index
    %c0_1 = arith.constant 0 : index
    %0 = vector.load %arg1[%c0, %c0_0, %c0_1] : memref<1x8x128xbf16, #tpu.memory_space<vmem>>, vector<1x8x128xbf16>
    %1 = vector.shape_cast %0 : vector<1x8x128xbf16> to vector<8x128xbf16>
    %c0_2 = arith.constant 0 : index
    %c0_3 = arith.constant 0 : index
    %2 = vector.load %arg3[%c0_2, %c0_3] : memref<128x384xbf16, #tpu.memory_space<vmem>>, vector<128x384xbf16>
    %cst = arith.constant dense<0.000000e+00> : vector<8x384xf32>
    %3 = tpu.matmul %1, %2, %cst {dimension_numbers = #tpu.dot_dimension_numbers<[1], [0], [0], [1], [0, 0, 1, 1], [], []>} : vector<8x128xbf16>, vector<128x384xbf16>, vector<8x384xf32> -> vector<8x384xf32>
    %4 = vector.extract_strided_slice %3 {offsets = [0, 0], sizes = [8, 128], strides = [1, 1]} : vector<8x384xf32> to vector<8x128xf32>
    %5 = arith.truncf %4 : vector<8x128xf32> to vector<8x128xbf16>
    %6 = vector.extract_strided_slice %3 {offsets = [0, 128], sizes = [8, 128], strides = [1, 1]} : vector<8x384xf32> to vector<8x128xf32>
    %7 = arith.truncf %6 : vector<8x128xf32> to vector<8x128xbf16>
    %8 = vector.extract_strided_slice %3 {offsets = [0, 256], sizes = [8, 128], strides = [1, 1]} : vector<8x384xf32> to vector<8x128xf32>
    %9 = arith.truncf %8 : vector<8x128xf32> to vector<8x128xbf16>
    %cst_4 = arith.constant dense<0.000000e+00> : vector<8x8xf32>
    %10 = tpu.matmul %5, %7, %cst_4 {dimension_numbers = #tpu.dot_dimension_numbers<[1], [1], [0], [0], [0, 0, 1, 0], [], []>} : vector<8x128xbf16>, vector<8x128xbf16>, vector<8x8xf32> -> vector<8x8xf32>
    %cst_5 = arith.constant 0.0883883461 : f32
    %11 = vector.broadcast %cst_5 : f32 to vector<8x8xf32>
    %12 = arith.mulf %10, %11 : vector<8x8xf32>
    %c0_6 = arith.constant 0 : index
    %c0_7 = arith.constant 0 : index
    %c0_8 = arith.constant 0 : index
    %13 = vector.load %arg2[%c0_6, %c0_7, %c0_8] : memref<1x1x8xf32, #tpu.memory_space<vmem>>, vector<1x1x8xf32>
    %14 = vector.shape_cast %13 : vector<1x1x8xf32> to vector<1x8xf32>
    %15 = vector.broadcast %14 : vector<1x8xf32> to vector<8x8xf32>
    %16 = arith.addf %12, %15 : vector<8x8xf32>
    %cst_9 = arith.constant dense<0xFF800000> : vector<8xf32>
    %17 = vector.multi_reduction <maximumf>, %16, %cst_9 [1] : vector<8x8xf32> to vector<8xf32>
    %18 = vector.shape_cast %17 : vector<8xf32> to vector<8x1xf32>
    %19 = vector.broadcast %18 : vector<8x1xf32> to vector<8x8xf32>
    %20 = arith.subf %16, %19 : vector<8x8xf32>
    %21 = math.exp %20 : vector<8x8xf32>
    %cst_10 = arith.constant dense<0.000000e+00> : vector<8xf32>
    %22 = vector.multi_reduction <add>, %21, %cst_10 [1] : vector<8x8xf32> to vector<8xf32>
    %23 = vector.shape_cast %22 : vector<8xf32> to vector<8x1xf32>
    %24 = tpu.reciprocal %23 {approx = true} : vector<8x1xf32> -> vector<8x1xf32>
    %25 = vector.broadcast %24 : vector<8x1xf32> to vector<8x8xf32>
    %26 = arith.mulf %21, %25 : vector<8x8xf32>
    %c0_11 = arith.constant 0 : index
    %c0_12 = arith.constant 0 : index
    %c0_13 = arith.constant 0 : index
    %27 = vector.load %arg6[%c0_11, %c0_12, %c0_13] : memref<1x8x8xf32, #tpu.memory_space<vmem>>, vector<1x8x8xf32>
    %28 = vector.shape_cast %27 : vector<1x8x8xf32> to vector<8x8xf32>
    %29 = vector.shape_cast %26 : vector<8x8xf32> to vector<1x8x8xf32>
    tpu.vector_store %arg6[%c0_11, %c0_12, %c0_13], %29 {strides = array<i32>} : memref<1x8x8xf32, #tpu.memory_space<vmem>>, vector<1x8x8xf32>,
    %30 = arith.truncf %26 : vector<8x8xf32> to vector<8x8xbf16>
    %cst_14 = arith.constant dense<0.000000e+00> : vector<8x128xf32>
    %31 = tpu.matmul %30, %9, %cst_14 {dimension_numbers = #tpu.dot_dimension_numbers<[1], [0], [0], [1], [0, 0, 1, 1], [], []>} : vector<8x8xbf16>, vector<8x128xbf16>, vector<8x128xf32> -> vector<8x128xf32>
    %32 = arith.extf %1 : vector<8x128xbf16> to vector<8x128xf32>
    %33 = arith.truncf %31 : vector<8x128xf32> to vector<8x128xbf16>
    %c0_15 = arith.constant 0 : index
    %c0_16 = arith.constant 0 : index
    %34 = vector.load %arg4[%c0_15, %c0_16] : memref<128x128xbf16, #tpu.memory_space<vmem>>, vector<128x128xbf16>
    %cst_17 = arith.constant dense<0.000000e+00> : vector<8x128xf32>
    %35 = tpu.matmul %33, %34, %cst_17 {dimension_numbers = #tpu.dot_dimension_numbers<[1], [0], [0], [1], [0, 0, 1, 1], [], []>} : vector<8x128xbf16>, vector<128x128xbf16>, vector<8x128xf32> -> vector<8x128xf32>
    %36 = arith.addf %32, %35 : vector<8x128xf32>
    %37 = arith.truncf %36 : vector<8x128xf32> to vector<8x128xbf16>
    %c0_18 = arith.constant 0 : index
    %c0_19 = arith.constant 0 : index
    %c0_20 = arith.constant 0 : index
    %38 = vector.load %arg5[%c0_18, %c0_19, %c0_20] : memref<1x8x128xbf16, #tpu.memory_space<vmem>>, vector<1x8x128xbf16>
    %39 = vector.shape_cast %38 : vector<1x8x128xbf16> to vector<8x128xbf16>
    %40 = vector.shape_cast %37 : vector<8x128xbf16> to vector<1x8x128xbf16>
    tpu.vector_store %arg5[%c0_18, %c0_19, %c0_20], %40 {strides = array<i32>} : memref<1x8x128xbf16, #tpu.memory_space<vmem>>, vector<1x8x128xbf16>,
    return
  }
  func.func @transform_0(%arg0: i32) -> (i32, i32, i32) {
    %c0_i32 = arith.constant 0 : i32
    %c0_i32_0 = arith.constant 0 : i32
    %c0_i32_1 = arith.constant 0 : i32
    return %arg0, %c0_i32, %c0_i32_0 : i32, i32, i32
  }
  func.func @transform_1(%arg0: i32) -> (i32, i32, i32) {
    %c0_i32 = arith.constant 0 : i32
    %c0_i32_0 = arith.constant 0 : i32
    %c0_i32_1 = arith.constant 0 : i32
    return %arg0, %c0_i32, %c0_i32_0 : i32, i32, i32
  }
  func.func @transform_2(%arg0: i32) -> (i32, i32) {
    %c0_i32 = arith.constant 0 : i32
    %c0_i32_0 = arith.constant 0 : i32
    %c0_i32_1 = arith.constant 0 : i32
    return %c0_i32, %c0_i32_0 : i32, i32
  }
  func.func @transform_3(%arg0: i32) -> (i32, i32) {
    %c0_i32 = arith.constant 0 : i32
    %c0_i32_0 = arith.constant 0 : i32
    %c0_i32_1 = arith.constant 0 : i32
    return %c0_i32, %c0_i32_0 : i32, i32
  }
  func.func @transform_4(%arg0: i32) -> (i32, i32, i32) {
    %c0_i32 = arith.constant 0 : i32
    %c0_i32_0 = arith.constant 0 : i32
    %c0_i32_1 = arith.constant 0 : i32
    return %arg0, %c0_i32, %c0_i32_0 : i32, i32, i32
  }
  func.func @transform_5(%arg0: i32) -> (i32, i32, i32) {
    %c0_i32 = arith.constant 0 : i32
    %c0_i32_0 = arith.constant 0 : i32
    %c0_i32_1 = arith.constant 0 : i32
    return %arg0, %c0_i32, %c0_i32_0 : i32, i32, i32
  }
}

</mosaic_0001>

<bundles_post_ra>
// kernel: tpu_custom_call.1
= control target key start
LH: loop header
LB: loop body
LE: loop exit
PB: predicated region body
PF: predicated region fallthrough
CT: control target
= control target key end

     0   :  { %11 = vsyncpa [#allocation3], 0  ;;  %s1700_s0 = inlined_call_operand.hbm [shape: bf16[2,8,128], index: 0, kind: input, shape index: {}]   ;;  %s1701_s1 = inlined_call_operand.vmem [shape: f32[2,1,8], index: 1, kind: input, shape index: {}]   ;;  %s1702_s2 = inlined_call_operand.hbm [shape: bf16[128,384], index: 2, kind: input, shape index: {}]   ;;  %s1703_s3 = inlined_call_operand.hbm [shape: bf16[128,128], index: 3, kind: input, shape index: {}]   ;;  %s1704_s4 = inlined_call_operand.hbm [shape: bf16[2,8,128], index: 4, kind: output, shape index: {0}]   ;;  %s1705_s5 = inlined_call_operand.hbm [shape: f32[2,8,8], index: 5, kind: output, shape index: {1}]  }
   0x1   :  { %13 = vsyncpa [#allocation3 + $0x1], 0 }
   0x2   :  { %14 = vsyncpa [#allocation6], 0 }
   0x3   :  { %15 = vsyncpa [#allocation4], 0 }
   0x4   :  { %17 = vsyncpa [#allocation4 + $0x1], 0 }
   0x5   :  { %18 = vsyncpa [#allocation10], 0 }
   0x6   :  { %20 = vsyncpa [#allocation10 + $0x1], 0  ;;  %s1403_s18 = smov 0   ;;  %s1405_s19 = smov 0  }
   0x7   :  { %s1407_s20 = smov 0   ;;  %s1409_s21 = smov 0  }
   0x8 LB: > { %s1424_s22 = sadd.s32 4294967295, %s1359_s21   ;;  %s921_s23 = sadd.s32 4294967294, %s1359_s21   ;;  %s1359_s21 = sphi %s1409_s21, %s1725_s21   ;;  %s1355_s20 = sphi %s1407_s20, %s1724_s20   ;;  %s1351_s19 = sphi %s1405_s19, %s1723_s19   ;;  %s1347_s18 = sphi %s1403_s18, %s1722_s18  }
   0x9   : > { %p46_p0 = scmp.ne.s32.totalorder %s1351_s19, %s1347_s18  ;;  %p1706_p1 = scmp.eq.s32.totalorder %s1424_s22, 0 }
   0xa   : > { %p144_p3 = scmp.eq.s32.totalorder %s921_s23, 1  ;;  %p922_p5 = scmp.ge.s32.totalorder %s1359_s21, 1 }
   0xb   : > { %p1433_p4 = por %p1706_p1, %p46_p0  ;;  %p177_p7 = scmp.lt.s32.totalorder %s1359_s21, 3 }
   0xc   : > { %p1438_p6 = por %p144_p3, %p46_p0  ;;  %s1361_s27 = smov [#allocation5]  }
   0xd   : > { %s1709_s24 = scalar_select %p1433_p4, 1, 0 }
   0xe   : > { %s1710_s25 = scalar_select %p1438_p6, 1, 0 }
   0xf   : > { %p1443_p8 = pnand %p922_p5, %p177_p7  ;;  %s189_s28 = sshll.u32 %s1361_s27, 4  ;;  %s1447_s28 = int_to_ptr.vmem [resolvable:$true] %s189_s28 }
  0x10   : > { %s1362_s30 = smov [#allocation7]   ;;  %s1171_s9 = scalar_lea.hbm %s1702_s2, 3072 }
  0x11   : > { %p1062_p9 = pneg %p1443_p8  ;;  %s202_s6 = sshll.u32 %s1362_s30, 4  ;;  %s1458_s6 = int_to_ptr.vmem [resolvable:$true] %s202_s6 }
  0x12   : > { %p1172_p12 = scmp.ne.s32.totalorder %s1702_s2, %s1171_s9  ;;  %p1178_p5 = scmp.lt.u32.totalorder %s1171_s9, %s1702_s2 }
  0x13   : > { %p1454_p11 = pnand %p1062_p9, %p1706_p1 }
  0x15   : > { %p1173_p13 = pneg %p1454_p11 }
  0x17   : > { %p1174_p0 = pnand %p1173_p13, %p1172_p12 }
  0x19   : > { %p1175_p3 = pneg %p1174_p0 }
  0x1b   : > { %p1180_p7 = pnand %p1178_p5, %p1175_p3 }
  0x1d   : > { %1183 = shalt.err (!%p1180_p7)
}
  0x1e   : > { %s1184_s14 = scalar_lea.vmem %s1447_s28, 3072  ;;  %p1192_p2 = scmp.lt.s32.totalorder %s1447_s28, %s1447_s28 }
  0x1f   : > { %p1185_p9 = scmp.ne.s32.totalorder %s1447_s28, %s1184_s14  ;;  %p1193_p12 = scmp.lt.s32.totalorder %s1184_s14, %s1184_s14 }
  0x21   : > { %p1187_p10 = pnand %p1185_p9, %p1173_p13  ;;  %p1194_p0 = por %p1193_p12, %p1192_p2 }
  0x23   : > { %p1188_p1 = pneg %p1187_p10 }
  0x25   : > { %p1195_p6 = pnand %p1194_p0, %p1188_p1 }
  0x27   : > { %1198 = shalt.err (!%p1195_p6)
}
  0x28   : > { %s1363_s15 = smov 192   ;;  %s1364_s16 = smov 12  }
  0x29   : > { %1065 = dma.hbm_to_vmem [thread:$0]  (!%p1454_p11), %s1702_s2, 3072, %s1447_s28, [#allocation6], %s1363_s15, %s1363_s15, %s1364_s16  }
  0x2a   : > { %s1199_s7 = scalar_lea.hbm %s1703_s3, 1024 }
  0x2b   : > { %p1200_p2 = scmp.ne.s32.totalorder %s1703_s3, %s1199_s7  ;;  %p1206_p10 = scmp.lt.u32.totalorder %s1199_s7, %s1703_s3 }
  0x2d   : > { %p1202_p1 = pnand %p1200_p2, %p1173_p13 }
  0x2f   : > { %p1203_p6 = pneg %p1202_p1 }
  0x31   : > { %p1208_p3 = pnand %p1206_p10, %p1203_p6 }
  0x33   : > { %1211 = shalt.err (!%p1208_p3)
}
  0x34   : > { %s1212_s28 = scalar_lea.vmem %s1458_s6, 1024  ;;  %p1220_p12 = scmp.lt.s32.totalorder %s1458_s6, %s1458_s6 }
  0x35   : > { %p1213_p5 = scmp.ne.s32.totalorder %s1458_s6, %s1212_s28  ;;  %p1221_p0 = scmp.lt.s32.totalorder %s1212_s28, %s1212_s28 }
  0x37   : > { %p1215_p7 = pnand %p1213_p5, %p1173_p13  ;;  %p1222_p2 = por %p1221_p0, %p1220_p12 }
  0x39   : > { %p1216_p9 = pneg %p1215_p7 }
  0x3b   : > { %p1223_p1 = pnand %p1222_p2, %p1216_p9 }
  0x3d   : > { %1226 = shalt.err (!%p1223_p1)
}
  0x3e   : > { %s1365_s12 = smov 64   ;;  %s1366_s13 = smov 4  }
  0x3f   : > { %1068 = dma.hbm_to_vmem [thread:$0]  (!%p1454_p11), %s1703_s3, 1024, %s1458_s6, [#allocation6], %s1365_s12, %s1365_s12, %s1366_s13  }
  0x40   : > { %s1513_s16 = sadd.s32 1, %s1359_s21   ;;  %s33_s23 = sadd.s32 1, %s1355_s20 }
  0x41   : > { %s30_s17 = ssub.s32 %s1359_s21, %s1513_s16  ;;  %p40_p6 = scmp.ne.s32.totalorder %s1355_s20, %s1351_s19 }
  0x42   : > { %p31_p13 = scmp.eq.s32.totalorder %s30_s17, 0  ;;  %p41_p10 = scmp.eq.s32.totalorder %s1359_s21, 0 }
  0x43   : > { %p1713_p5 = scmp.eq.s32.totalorder %s1424_s22, 1  ;;  %p1082_p9 = scmp.lt.s32.totalorder %s1359_s21, 2 }
  0x44   : > { %s1522_s27 = scalar_select %p31_p13, %s1355_s20, %s33_s23  }
  0x45   : > { %p42_p3 = por %p41_p10, %p40_p6  ;;  %p1526_p7 = por %p1713_p5, %p40_p6 }
  0x46   : > { %s216_s29 = sand.u32 1, %s1355_s20   ;;  %s927_s6 = sshll.u32 %s1359_s21, 6 }
  0x47   : > { %s1714_s30 = scalar_select %p1526_p7, 1, 0 }
  0x48   : > { %s926_s7 = sshll.u32 %s216_s29, 2  ;;  %s1536_s10 = scalar_lea.hbm %s1700_s0, %s927_s6 }
  0x49   : > { %s220_s11 = scalar_lea.vmem [#allocation2], %s926_s7  ;;  %p1540_p11 = pnand %p1082_p9, %p42_p3 }
  0x4a   : > { %s227_s28 = sshll.u32 %s220_s11, 4  ;;  %s217_s13 = scalar_lea.sflag [#allocation3], %s216_s29  ;;  %s1538_s28 = int_to_ptr.vmem [resolvable:$true] %s227_s28 }
  0x4b   : > { %s1227_s14 = scalar_lea.hbm %s1536_s10, 64  ;;  %p1229_p0 = pneg %p1540_p11 }
  0x4c   : > { %p1228_p12 = scmp.ne.s32.totalorder %s1536_s10, %s1227_s14  ;;  %s1232_s23 = scalar_lea.hbm %s1700_s0, 128 }
  0x4d   : > { %p1233_p13 = scmp.lt.u32.totalorder %s1536_s10, %s1700_s0  ;;  %p1234_p6 = scmp.lt.u32.totalorder %s1232_s23, %s1227_s14 }
  0x4e   : > { %p1230_p2 = pnand %p1229_p0, %p1228_p12  ;;  %p1236_p3 = scmp.lt.u32.totalorder %s1227_s14, %s1536_s10 }
  0x4f   : > { %p1235_p10 = por %p1234_p6, %p1233_p13 }
  0x50   : > { %p1231_p1 = pneg %p1230_p2 }
  0x51   : > { %p1237_p5 = por %p1236_p3, %p1235_p10 }
  0x53   : > { %p1238_p9 = pnand %p1237_p5, %p1231_p1 }
  0x55   : > { %1241 = shalt.err (!%p1238_p9)
}
  0x56   : > { %s1242_s29 = scalar_lea.vmem %s1538_s28, 64  ;;  %s1367_s8 = smov [#allocation2]  }
  0x57   : > { %p1243_p12 = scmp.ne.s32.totalorder %s1538_s28, %s1242_s29  ;;  %s1247_s9 = sshll.u32 %s1367_s8, 4  ;;  %s1248_s9 = int_to_ptr.vmem [resolvable:$false] %s1247_s9 }
  0x58   : > { %s1249_s11 = scalar_lea.vmem %s1248_s9, 128  ;;  %p1250_p4 = scmp.lt.s32.totalorder %s1538_s28, %s1248_s9 }
  0x59   : > { %p1245_p2 = pnand %p1243_p12, %p1229_p0  ;;  %p1251_p13 = scmp.lt.s32.totalorder %s1249_s11, %s1242_s29 }
  0x5b   : > { %p1246_p7 = pneg %p1245_p2  ;;  %p1252_p6 = por %p1251_p13, %p1250_p4 }
  0x5d   : > { %p1253_p10 = pnand %p1252_p6, %p1246_p7 }
  0x5f   : > { %1256 = shalt.err (!%p1253_p10)
}
  0x60   : > { %1072 = dma.hbm_to_vmem [thread:$0]  (!%p1540_p11), %s1536_s10, 64, %s1538_s28, %s217_s13  }
  0x61   : > { %242 = sbr.rel (%p1443_p8) target bundleno = 1340 (0x53c), region = 36  ;;  %s1572_s14 = sand.u32 (!%p1443_p8), 1, %s1351_s19  }
  0x62   : > { %s929_s15 = sshll.u32 (!%p1443_p8), %s1572_s14, 2  ;;  %s245_s17 = scalar_lea.sflag (!%p1443_p8), [#allocation3], %s1572_s14 }
  0x63   : > { %s1578_s23 = scalar_lea.vmem (!%p1443_p8), [#allocation2], %s929_s15  ;;  %p1716_p4 = scmp.ne.s32.totalorder (!%p1443_p8), %s1709_s24, 0 }
  0x68   : > { %1330 = dma.done.wait (%p1716_p4), %s245_s17, 64  }
  0x69   : > { %1332 = vsyncadd (%p1716_p4), %s245_s17, 4294967232  ;;  %p1717_p7 = scmp.eq.s32.totalorder %s1424_s22, 0 }
  0x6b   : > { %1334 = dma.done.wait (%p1717_p7), [#allocation6], 4096   ;;  %p1718_p8 = pmov %p1717_p7 }
  0x6c   : > { %v1368_v0 = vmov 0   ;;  %v1369_v1 = vmov 0.0   ;;  %v1127_v2 = vld [vmem:[#allocation5 + $0x4] ss:$12 sps:$4 sm:$0xff]   ;;  %v1129_v3 = vld [vmem:[#allocation5] ss:$12 sps:$4 sm:$0xff]  }
  0x6d   : > { %1336 = vsyncadd (%p1718_p8), [#allocation6], 4294963200  ;;  %488 = vmatprep.mubr.bf16.mxu0 %v1368_v0  ;;  %996 = vmatprep.subr.bf16.mxu1 %v1369_v1  ;;  %v1130_v4 = vld [vmem:[#allocation5 + $0x1c] ss:$12 sps:$4 sm:$0xff]   ;;  %v1132_v5 = vld [vmem:[#allocation5 + $0x18] ss:$12 sps:$4 sm:$0xff]  }
  0x6e   : > { %456 = vmatprep.subr.bf16.mxu0 %v1127_v2  ;;  %v1133_v6 = vld [vmem:[#allocation5 + $0x34] ss:$12 sps:$4 sm:$0xff]   ;;  %v1135_v7 = vld [vmem:[#allocation5 + $0x30] ss:$12 sps:$4 sm:$0xff]   ;;  %v1136_v8 = vld [vmem:[#allocation5 + $0x4c] ss:$12 sps:$4 sm:$0xff]  }
  0x6f   : > { %457 = vmatpush1.bf16.msra.mxu0 %v1129_v3  ;;  %v1138_v9 = vld [vmem:[#allocation5 + $0x48] ss:$12 sps:$4 sm:$0xff]   ;;  %v1139_v11 = vld [vmem:[#allocation5 + $0x64] ss:$12 sps:$4 sm:$0xff]   ;;  %v1152_v12 = vld [vmem:[#allocation5 + $0x20] ss:$12 sps:$4 sm:$0xff]  }
  0x70   : > { %458 = vmatprep.subr.bf16.mxu0 %v1130_v4  ;;  %v1151_v10 = vld [vmem:[#allocation5 + $0x8] ss:$12 sps:$4 sm:$0xff]   ;;  %v1141_v13 = vld [vmem:[#allocation5 + $0x60] ss:$12 sps:$4 sm:$0xff]   ;;  %v1144_v15 = vld [vmem:[#allocation5 + $0x78] ss:$12 sps:$4 sm:$0xff]  }
  0x71   : > { %997 = vmatpush3.bf16.msra.mxu1 %v1151_v10  ;;  %v1142_v14 = vld [vmem:[#allocation5 + $0x7c] ss:$12 sps:$4 sm:$0xff]   ;;  %v1153_v16 = vld [vmem:[#allocation5 + $0x38] ss:$12 sps:$4 sm:$0xff]   ;;  %v1145_v17 = vld [vmem:[#allocation5 + $0x94] ss:$12 sps:$4 sm:$0xff]  }
  0x72   : > { %998 = vmatprep.subr.bf16.mxu1 %v1369_v1  ;;  %v1154_v18 = vld [vmem:[#allocation5 + $0x50] ss:$12 sps:$4 sm:$0xff]   ;;  %v1148_v20 = vld [vmem:[#allocation5 + $0xac] ss:$12 sps:$4 sm:$0xff]   ;;  %v1155_v21 = vld [vmem:[#allocation5 + $0x68] ss:$12 sps:$4 sm:$0xff]  }
  0x73   : > { %459 = vmatpush1.bf16.msra.mxu0 %v1132_v5  ;;  %v1147_v19 = vld [vmem:[#allocation5 + $0x90] ss:$12 sps:$4 sm:$0xff]   ;;  %v1150_v22 = vld [vmem:[#allocation5 + $0xa8] ss:$12 sps:$4 sm:$0xff]   ;;  %v1156_v23 = vld [vmem:[#allocation5 + $0x80] ss:$12 sps:$4 sm:$0xff]  }
  0x74   : > { %460 = vmatprep.subr.bf16.mxu0 %v1133_v6  ;;  %v1595_v24 = vld [vmem:[%s1578_s23] sm:$0xf]  ;;  %vm1370_vm0 = vmmov 0   ;;  %vm606_vm1 = vcmask 1043456   ;;  %p291_p11 = scmp.lt.s32.totalorder %s1424_s22, 1  ;;  %vm589_vm2 = vcmask 64512  }
  0x75   : > { %999 = vmatpush3.bf16.msra.mxu1 %v1152_v12  ;;  %v1157_v25 = vld [vmem:[#allocation5 + $0x98] ss:$12 sps:$4 sm:$0xff]   ;;  %v1158_v26 = vld [vmem:[#allocation5 + $0xb0] ss:$12 sps:$4 sm:$0xff]   ;;  %1012 = vmatprep.mubr.msk.bf16.mxu1 %vm1370_vm0, %v1369_v1  ;;  %v1160_v53 = vld [vmem:[#allocation7 + $0x8] sm:$0xff]   ;;  %s933_s12 = sshll.u32 %s1572_s14, 3 }
  0x76   : > { %1000 = vmatprep.subr.bf16.mxu1 %v1369_v1  ;;  %s292_s24 = scalar_select %p291_p11, %s1424_s22, 1  ;;  %v1159_v52 = vld [vmem:[#allocation7] sm:$0xff]   ;;  %v1161_v54 = vld [vmem:[#allocation7 + $0x10] sm:$0xff]   ;;  %v1162_v55 = vld [vmem:[#allocation7 + $0x18] sm:$0xff]  }
  0x77   : > { %461 = vmatpush1.bf16.msra.mxu0 %v1135_v7  ;;  %v1163_v56 = vld [vmem:[#allocation7 + $0x20] sm:$0xff]   ;;  %v1164_v57 = vld [vmem:[#allocation7 + $0x28] sm:$0xff]   ;;  %v1165_v58 = vld [vmem:[#allocation7 + $0x30] sm:$0xff]   ;;  %s290_s13 = scalar_lea.vmem [#allocation9], %s933_s12  ;;  %s971_s7 = sshll.u32 %s1424_s22, 7 }
  0x78   : > { %462 = vmatprep.subr.bf16.mxu0 %v1136_v8  ;;  %s293_s28 = scalar_lea.vmem %s1701_s1, %s292_s24  ;;  %v1166_v63 = vld [vmem:[#allocation7 + $0x38] sm:$0xff]   ;;  %s791_s6 = sshll.u32 %s290_s13, 4  ;;  %s792_s6 = int_to_ptr.vmem [resolvable:$true] %s791_s6 }
  0x79   : > { %1001 = vmatpush3.bf16.msra.mxu1 %v1153_v16  ;;  %v958_v40 = vld [vmem:[%s293_s28] ss:$0 sm:$0xff]  ;;  %s1629_s9 = scalar_lea.hbm %s1705_s5, %s971_s7  ;;  %s765_s11 = scalar_lea.sflag [#allocation10], %s1572_s14 }
  0x7a   : > { %1002 = vmatprep.subr.bf16.mxu1 %v1369_v1  ;;  %s1257_s17 = scalar_lea.vmem %s792_s6, 128  ;;  %p1719_p1 = scmp.ne.s32.totalorder %s1714_s30, 0 }
  0x7b   : > { %463 = vmatpush1.bf16.msra.mxu0 %v1138_v9  ;;  %p1258_p0 = scmp.ne.s32.totalorder %s792_s6, %s1257_s17  ;;  %s1371_s23 = smov [#allocation9]  }
  0x7c   : > { %464 = vmatprep.subr.bf16.mxu0 %v1139_v11  ;;  %s1261_s24 = sshll.u32 %s1371_s23, 4  ;;  %s1262_s24 = int_to_ptr.vmem [resolvable:$false] %s1261_s24 }
  0x7d   : > { %1003 = vmatpush3.bf16.msra.mxu1 %v1154_v18  ;;  %p1259_p3 = pnand %p1258_p0, %p1719_p1  ;;  %s1263_s26 = scalar_lea.vmem %s1262_s24, 256 }
  0x7e   : > { %1004 = vmatprep.subr.bf16.mxu1 %v1369_v1  ;;  %p1264_p9 = scmp.lt.s32.totalorder %s792_s6, %s1262_s24  ;;  %p1265_p12 = scmp.lt.s32.totalorder %s1263_s26, %s1257_s17 }
  0x7f   : > { %465 = vmatpush1.bf16.msra.mxu0 %v1141_v13  ;;  %p1260_p5 = pneg %p1259_p3 }
  0x80   : > { %466 = vmatprep.subr.bf16.mxu0 %v1142_v14  ;;  %p1266_p2 = por %p1265_p12, %p1264_p9 }
  0x81   : > { %1005 = vmatpush3.bf16.msra.mxu1 %v1155_v21 }
  0x82   : > { %1006 = vmatprep.subr.bf16.mxu1 %v1369_v1  ;;  %p1267_p13 = pnand %p1266_p2, %p1260_p5 }
  0x83   : > { %467 = vmatpush1.bf16.msra.mxu0 %v1144_v15 }
  0x84   : > { %468 = vmatprep.subr.bf16.mxu0 %v1145_v17 }
  0x85   : > { %1007 = vmatpush3.bf16.msra.mxu1 %v1156_v23 }
  0x86   : > { %1008 = vmatprep.subr.bf16.mxu1 %v1369_v1 }
  0x87   : > { %469 = vmatpush1.bf16.msra.mxu0 %v1147_v19 }
  0x88   : > { %470 = vmatprep.subr.bf16.mxu0 %v1148_v20 }
  0x89   : > { %1009 = vmatpush3.bf16.msra.mxu1 %v1157_v25 }
  0x8a   : > { %1010 = vmatprep.subr.bf16.mxu1 %v1369_v1 }
  0x8b   : > { %471 = vmatpush1.bf16.msra.mxu0 %v1150_v22 }
  0x8c   : > { %1028 = vmatprep.subr.bf16.mxu0 %v1369_v1 }
  0x8d   : > { %1011 = vmatpush3.bf16.msra.mxu1 %v1158_v26 }
  0x8e   : > { %489 = vmatmul.mubr.bf16.vlgmr.msra.gmra.mrb[0].mxu0 %v1595_v24  ;;  %1016 = vmatprep.subr.bf16.mxu1 %v1369_v1 }
  0x8f   : > { %1044 = vmatprep.mubr.msk.bf16.mxu0 %vm1370_vm0, %v1369_v1  ;;  %1029 = vmatpush3.bf16.msra.mxu0 %v1159_v52 }
  0x90   : > { %1013 = vmatmul.mubr.bf16.vlgmr.msra.gmra.mrb[0].mxu1 %v1595_v24  ;;  %1030 = vmatprep.subr.bf16.mxu0 %v1369_v1 }
  0x91   : > { %1018 = vmatprep.mubr.msk.bf16.mxu1 %vm1370_vm0, %v1369_v1 }
  0x93   : > { %1031 = vmatpush3.bf16.msra.mxu0 %v1160_v53 }
  0x94   : > { %1032 = vmatprep.subr.bf16.mxu0 %v1369_v1 }
  0x97   : > { %1033 = vmatpush3.bf16.msra.mxu0 %v1161_v54 }
  0x98   : > { %1034 = vmatprep.subr.bf16.mxu0 %v1369_v1 }
  0x9b   : > { %1035 = vmatpush3.bf16.msra.mxu0 %v1162_v55 }
  0x9c   : > { %1036 = vmatprep.subr.bf16.mxu0 %v1369_v1 }
  0x9f   : > { %1037 = vmatpush3.bf16.msra.mxu0 %v1163_v56 }
  0xa0   : > { %1038 = vmatprep.subr.bf16.mxu0 %v1369_v1 }
  0xa3   : > { %1039 = vmatpush3.bf16.msra.mxu0 %v1164_v57 }
  0xa4   : > { %1040 = vmatprep.subr.bf16.mxu0 %v1369_v1 }
  0xa7   : > { %1041 = vmatpush3.bf16.msra.mxu0 %v1165_v58 }
  0xa8   : > { %1042 = vmatprep.subr.bf16.mxu0 %v1369_v1 }
  0xab   : > { %1043 = vmatpush3.bf16.msra.mxu0 %v1166_v63 }
 0x161   : > { %v490_v27 = vpop.f32.mrb[0].mxu0 }
 0x162   : > { %v492_v28 = vpop.f32.mrb[1].mxu0  ;;  %v537_v32 = vpack.c.bf16 %v490_v27, %v490_v27 }
 0x163   : > { %v538_v29 = vpack.c.bf16 %v492_v28, %v492_v28  ;;  %v494_v30 = vpop.f32.mrb[2].mxu0  ;;  %v531_v33 = vpop.f32.mrb[0].mxu1 }
 0x164   : > { %v495_v31 = vpop.f32.mrb[3].mxu0  ;;  %v539_v34 = vpack.c.bf16 %v531_v33, %v531_v33  ;;  %v1014_v35 = vpop.f32.mrb[1].mxu1 }
 0x165   : > { %1017 = vmatpush3.bf16.xpose.msra.mxu1 %v538_v29  ;;  %v534_v36 = vpop.f32.mrb[2].mxu1 }
 0x166   : > { %1022 = vmatprep.subr.bf16.mxu1 %v1369_v1  ;;  %v608_v37 = vsel %vm606_vm1, %v539_v34, 0  ;;  %v1015_v38 = vpop.f32.mrb[3].mxu1 }
 0x16c   : > { %1019 = vmatmul.mubr.bf16.vlgmr.msra.gmra.mrb[4].mxu1 %v537_v32 }
 0x16d   : > { %1024 = vmatprep.mubr.msk.bf16.mxu1 %vm1370_vm0, %v1369_v1  ;;  %1023 = vmatpush3.bf16.msra.mxu1 %v608_v37 }
 0x23f   : > { %v574_v39 = vpop.f32.mrb[4].mxu1 }
 0x240   : > { %v580_v41 = vmul.f32 0.088388346, %v574_v39  ;;  %v1020_v42 = vpop.f32.mrb[5].mxu1 }
 0x241   : > { %v577_v43 = vpop.f32.mrb[6].mxu1 }
 0x242   : > { %v1021_v44 = vpop.f32.mrb[7].mxu1  ;;  %v588_v45 = vadd.f32 %v958_v40, %v580_v41 }
 0x244   : > { %v590_v46 = vsel %vm589_vm2, %v588_v45, -inf }
 0x245   : > { %591 = vmax.xlane.f32.xlu0 %v590_v46 }
 0x2d2   : > { %v592_v47 = vpop.xlane.xlu0 %591 }
 0x2d3   : > { %v593_v48 = vsub.f32 %v588_v45, %v592_v47 }
 0x2d5   : > { %v594_v49 = vmul.f32 1.442695, %v593_v48 }
 0x2d7   : > { %1167 = vpow2.f32 %v594_v49 }
 0x2e1   : > { %v1168_v50 = vpop.eup %1167 }
 0x2e2   : > { %v596_v51 = vsel %vm589_vm2, %v1168_v50, 0.0 }
 0x2e3   : > { %597 = vadd.xlane.f32.xlu0 %v596_v51 }
 0x370   : > { %v598_v59 = vpop.xlane.xlu0 %597 }
 0x371   : > { %1169 = vrcp.f32 %v598_v59 }
 0x37b   : > { %v1170_v60 = vpop.eup %1169 }
 0x37c   : > { %v600_v61 = vmul.f32 %v1170_v60, %v1168_v50 }
 0x37e   : > { %v602_v62 = vpack.c.bf16 %v600_v61, %v600_v61  ;;  %601 = vst.msk [vmem:[%s290_s13] sm:$0xff] %vm589_vm2, %v600_v61 }
 0x380   : > { %1025 = vmatmul.mubr.msk.bf16.vlgmr.msra.gmra.mrb[8].mxu1 %vm589_vm2, %v602_v62 }
 0x453   : > { %v644_v0 = vpop.f32.mrb[8].mxu1 }
 0x454   : > { %v651_v2 = vpack.c.bf16 %v644_v0, %v644_v0  ;;  %v1026_v3 = vpop.f32.mrb[9].mxu1 }
 0x455   : > { %v647_v1 = vpop.f32.mrb[10].mxu1 }
 0x456   : > { %v1027_v4 = vpop.f32.mrb[11].mxu1  ;;  %1045 = vmatmul.mubr.bf16.vlgmr.msra.gmra.mrb[4].mxu0 %v651_v2 }
 0x457   : > { %1270 = shalt.err (!%p1267_p13)
}
 0x458   : > { %s1271_s10 = scalar_lea.hbm %s1629_s9, 128  ;;  %s1275_s13 = scalar_lea.hbm %s1705_s5, 256 }
 0x459   : > { %p1272_p6 = scmp.ne.s32.totalorder %s1629_s9, %s1271_s10  ;;  %p1276_p7 = scmp.lt.u32.totalorder %s1629_s9, %s1705_s5 }
 0x45a   : > { %p1277_p8 = scmp.lt.u32.totalorder %s1275_s13, %s1271_s10  ;;  %p1279_p0 = scmp.lt.u32.totalorder %s1271_s10, %s1629_s9 }
 0x45b   : > { %p1273_p10 = pnand %p1272_p6, %p1719_p1 }
 0x45c   : > { %p1278_p11 = por %p1277_p8, %p1276_p7 }
 0x45d   : > { %p1274_p4 = pneg %p1273_p10 }
 0x45e   : > { %p1280_p3 = por %p1279_p0, %p1278_p11 }
 0x460   : > { %p1281_p5 = pnand %p1280_p3, %p1274_p4 }
 0x462   : > { %1284 = shalt.err (!%p1281_p5)
}
 0x463   : > { %1059 = dma.vmem_to_hbm [thread:$0]  (%p1719_p1), %s792_s6, 128, %s1629_s9, %s765_s11   ;;  %v650_v5 = vunpack.c.l.bf16 %v1595_v24 }
 0x464   : > { %s970_s8 = sshll.u32 %s1424_s22, 6  ;;  %s283_s17 = scalar_lea.vmem [#allocation8], %s929_s15 }
 0x465   : > { %s778_s23 = sshll.u32 %s283_s17, 4  ;;  %s1656_s10 = scalar_lea.hbm %s1704_s4, %s970_s8  ;;  %s1658_s23 = int_to_ptr.vmem [resolvable:$true] %s778_s23 }
 0x466   : > { %s760_s22 = scalar_lea.sflag [#allocation4], %s1572_s14  ;;  %s1285_s6 = scalar_lea.vmem %s1658_s23, 64 }
 0x467   : > { %p1286_p9 = scmp.ne.s32.totalorder %s1658_s23, %s1285_s6  ;;  %s1372_s15 = smov [#allocation8]  }
 0x468   : > { %s1289_s9 = sshll.u32 %s1372_s15, 4  ;;  %s1290_s9 = int_to_ptr.vmem [resolvable:$false] %s1289_s9 }
 0x469   : > { %p1287_p12 = pnand %p1286_p9, %p1719_p1  ;;  %s1291_s11 = scalar_lea.vmem %s1290_s9, 128 }
 0x46a   : > { %p1292_p13 = scmp.lt.s32.totalorder %s1658_s23, %s1290_s9  ;;  %p1293_p6 = scmp.lt.s32.totalorder %s1291_s11, %s1285_s6 }
 0x46b   : > { %p1288_p2 = pneg %p1287_p12 }
 0x46c   : > { %p1294_p10 = por %p1293_p6, %p1292_p13 }
 0x46e   : > { %p1295_p4 = pnand %p1294_p10, %p1288_p2 }
 0x529   : > { %v750_v6 = vpop.f32.mrb[4].mxu0 }
 0x52a   : > { %v756_v7 = vadd.f32 %v750_v6, %v650_v5  ;;  %v1046_v8 = vpop.f32.mrb[5].mxu0 }
 0x52b   : > { %v753_v9 = vpop.f32.mrb[6].mxu0 }
 0x52c   : > { %v757_v10 = vpack.c.bf16 %v756_v7, %v756_v7  ;;  %v1047_v11 = vpop.f32.mrb[7].mxu0 }
 0x52e   : > { %758 = vst [vmem:[%s283_s17] sm:$0xf] %v757_v10 }
 0x52f   : > { %1298 = shalt.err (!%p1295_p4)
}
 0x530   : > { %s1299_s14 = scalar_lea.hbm %s1656_s10, 64  ;;  %s1303_s13 = scalar_lea.hbm %s1704_s4, 128 }
 0x531   : > { %p1300_p7 = scmp.ne.s32.totalorder %s1656_s10, %s1299_s14  ;;  %p1304_p0 = scmp.lt.u32.totalorder %s1656_s10, %s1704_s4 }
 0x532   : > { %p1305_p3 = scmp.lt.u32.totalorder %s1303_s13, %s1299_s14  ;;  %p1307_p9 = scmp.lt.u32.totalorder %s1299_s14, %s1656_s10 }
 0x533   : > { %p1301_p8 = pnand %p1300_p7, %p1719_p1 }
 0x534   : > { %p1306_p5 = por %p1305_p3, %p1304_p0 }
 0x535   : > { %p1302_p11 = pneg %p1301_p8 }
 0x536   : > { %p1308_p12 = por %p1307_p9, %p1306_p5 }
 0x538   : > { %p1309_p2 = pnand %p1308_p12, %p1302_p11 }
 0x53a   : > { %1312 = shalt.err (!%p1309_p2)
}
 0x53b   : > { %1058 = dma.vmem_to_hbm [thread:$0]  (%p1719_p1), %s1658_s23, 64, %s1656_s10, %s760_s22  }
 0x53c PF: > { %s803_s8 = sand.u32 1, %s1347_s18   ;;  %p1720_p13 = scmp.ne.s32.totalorder %s1710_s25, 0 }
 0x53d   : > { %p1721_p6 = scmp.ge.s32.totalorder %s1359_s21, 2  ;;  %s804_s17 = scalar_lea.sflag [#allocation4], %s803_s8 }
 0x53f   : > { %p1074_p10 = pnand %p1721_p6, %p1720_p13 }
 0x541   : > { %1338 = dma.done.wait (!%p1074_p10), %s804_s17, 64  }
 0x542   : > { %1340 = vsyncadd (!%p1074_p10), %s804_s17, 4294967232  ;;  %s813_s24 = scalar_lea.sflag [#allocation10], %s803_s8 }
 0x543   : > { %1342 = dma.done.wait (!%p1074_p10), %s813_s24, 128  }
 0x544   : > { %1344 = vsyncadd (!%p1074_p10), %s813_s24, 4294967168  ;;  %p23_p1 = scmp.ge.s32.totalorder %s1513_s16, 4   ;;  %s1722_s18 = smov %s1351_s19 }
 0x545   : > { %s1723_s19 = smov %s1355_s20  ;;  %s1724_s20 = smov %s1522_s27 }
 0x546   : > { %s1725_s21 = smov %s1513_s16  ;;  %25 = sbr.rel (!%p23_p1) target bundleno = 8 (0x8), region = 109 }
 0x54d   :  { %818 = vsyncpa [#allocation3], 1 }
 0x54e   :  { %820 = vsyncpa [#allocation3 + $0x1], 1 }
 0x54f   :  { %821 = vsyncpa [#allocation6], 1 }
 0x550   :  { %822 = vsyncpa [#allocation4], 1 }
 0x551   :  { %824 = vsyncpa [#allocation4 + $0x1], 1 }
 0x552   :  { %825 = vsyncpa [#allocation10], 1 }
 0x553   :  { %827 = vsyncpa [#allocation10 + $0x1], 1 }

</bundles_post_ra>
